<compile_context>
chip_gen: v7x
topology: tpu7x:2x2x1
jax: 0.10.0
libtpu: 0.0.40
codegen_flags: <defaults>
</compile_context>

<pallas_src>
import jax
import jax.numpy as jnp
from jax.experimental import pallas as pl
from jax.experimental.pallas import tpu as pltpu


def _proj_kernel(x_ref, w_ref, b_ref, o_ref):
    # x_ref: (Cin, tn) tile of one batch element's (Cin, N) slab.
    # w_ref: (Cin, E)  bf16 weight, VMEM-resident (constant index map).
    # b_ref: (1, E)    f32 bias.
    # o_ref: (tn, E)   output tile, final dtype.
    xt = x_ref[...].T.astype(w_ref.dtype)          # XLU transpose + bf16 cast
    acc = jnp.dot(xt, w_ref[...], preferred_element_type=jnp.float32)
    o_ref[...] = (acc + b_ref[...]).astype(o_ref.dtype)


def mlp_pallas(x, w, b, *, tn=512, mxu_dtype=jnp.bfloat16):
    """x: (B, Cin, H, W); w: (Cin, E); b: (E,). Returns (B, H*W, E) in x.dtype."""
    B, C, H, W = x.shape
    Cw, E = w.shape
    assert C == Cw
    N = H * W

    # flatten(2): (B, C, H, W) -> (B, C, N).  Contiguous reshape: no HBM pass,
    # N stays the lane-dense (last) axis.
    x3 = x.reshape(B, C, N)

    # Token tile: full N when small, else a lane-dense multiple of 128.  A
    # trailing partial block (N % tn != 0) is handled by pl.cdiv + masked store.
    if N <= tn:
        tn = N
    else:
        tn = max(128, (tn // 128) * 128)
    grid = (B, pl.cdiv(N, tn))

    w_mxu = w.astype(mxu_dtype)                    # weight is tiny: cast once
    b2 = b.reshape(1, E).astype(jnp.float32)

    return pl.pallas_call(
        _proj_kernel,
        out_shape=jax.ShapeDtypeStruct((B, N, E), x.dtype),
        grid_spec=pltpu.PrefetchScalarGridSpec(
            num_scalar_prefetch=0,
            grid=grid,
            in_specs=[
                # activations: (1, C, tn) block, batch dim squeezed away
                pl.BlockSpec((pl.Squeezed(), C, tn), lambda bi, ni: (bi, 0, ni)),
                # weight: full array, constant block -> stays VMEM-resident
                pl.BlockSpec((C, E), lambda bi, ni: (0, 0)),
                # bias
                pl.BlockSpec((1, E), lambda bi, ni: (0, 0)),
            ],
            out_specs=pl.BlockSpec((pl.Squeezed(), tn, E),
                                   lambda bi, ni: (bi, ni, 0)),
        ),
        compiler_params=pltpu.CompilerParams(
            dimension_semantics=("parallel", "parallel")),
        # TODO(synk): on v5e (16 MiB default scoped VMEM) with Cin~2048 and
        # tn>=1024, pass vmem_limit_bytes here or cap tn at 512.
    )(x3, w_mxu, b2)


def mlp_reference(x, w, b):
    """Pure-JAX f32 reference matching the PyTorch module forward."""
    B, C, H, W = x.shape
    t = x.reshape(B, C, H * W).transpose(0, 2, 1)          # (B, N, C)
    return jnp.einsum("bnc,ce->bne", t, w) + b


if __name__ == "__main__":
    # Small lane-dense stand-in for MLP(input_dim=2048, embed_dim=768).
    B, C, H, W = 2, 256, 16, 16
    E = 128

    key = jax.random.PRNGKey(0)
    kx, kw, kb = jax.random.split(key, 3)
    x = jax.random.normal(kx, (B, C, H, W), jnp.float32)
    w = 0.02 * jax.random.normal(kw, (C, E), jnp.float32)
    b = 0.02 * jax.random.normal(kb, (E,), jnp.float32)

    out = jax.block_until_ready(mlp_pallas(x, w, b))

    ref = mlp_reference(x, w, b)
    assert out.shape == (B, H * W, E)
    assert out.dtype == x.dtype
    # bf16 MXU operands vs f32 reference -> relaxed tolerance.
    assert jnp.allclose(out, ref, atol=2e-2, rtol=2e-2), "mismatch vs reference"

    print("KERNEL_OK")
</pallas_src>

<mosaic_0001>
module attributes {stable_mosaic.version = 11 : i64} {
  func.func @_proj_kernel(%arg0: i32, %arg1: i32, %arg2: memref<1x256x256xf32, #tpu.memory_space<vmem>>, %arg3: memref<256x128xbf16, #tpu.memory_space<vmem>>, %arg4: memref<1x128xf32, #tpu.memory_space<vmem>>, %arg5: memref<1x256x128xf32, #tpu.memory_space<vmem>>) attributes {dimension_semantics = [#tpu.dimension_semantics<parallel>, #tpu.dimension_semantics<parallel>], iteration_bounds = array<i64: 2, 1>, scalar_prefetch = 0 : i64, scratch_operands = 0 : i64, tpu.core_type = #tpu.core_type<tc>, window_params = [{transform_indices = @transform_0, window_bounds = array<i64: 1, 256, 256>}, {pipeline_mode = #tpu.pipeline_mode<synchronous>, transform_indices = @transform_1, window_bounds = array<i64: 256, 128>}, {pipeline_mode = #tpu.pipeline_mode<synchronous>, transform_indices = @transform_2, window_bounds = array<i64: 1, 128>}, {transform_indices = @transform_3, window_bounds = array<i64: 1, 256, 128>}]} {
    %c0 = arith.constant 0 : index
    %c0_0 = arith.constant 0 : index
    %c0_1 = arith.constant 0 : index
    %0 = vector.load %arg2[%c0, %c0_0, %c0_1] : memref<1x256x256xf32, #tpu.memory_space<vmem>>, vector<1x256x256xf32>
    %1 = vector.shape_cast %0 : vector<1x256x256xf32> to vector<256x256xf32>
    %2 = tpu.transpose %1, [1, 0] : vector<256x256xf32> -> vector<256x256xf32>
    %3 = arith.truncf %2 : vector<256x256xf32> to vector<256x256xbf16>
    %c0_2 = arith.constant 0 : index
    %c0_3 = arith.constant 0 : index
    %4 = vector.load %arg3[%c0_2, %c0_3] : memref<256x128xbf16, #tpu.memory_space<vmem>>, vector<256x128xbf16>
    %cst = arith.constant dense<0.000000e+00> : vector<256x128xf32>
    %5 = tpu.matmul %3, %4, %cst {dimension_numbers = #tpu.dot_dimension_numbers<[1], [0], [0], [1], [0, 0, 1, 1], [], []>} : vector<256x256xbf16>, vector<256x128xbf16>, vector<256x128xf32> -> vector<256x128xf32>
    %c0_4 = arith.constant 0 : index
    %c0_5 = arith.constant 0 : index
    %6 = vector.load %arg4[%c0_4, %c0_5] : memref<1x128xf32, #tpu.memory_space<vmem>>, vector<1x128xf32>
    %7 = vector.broadcast %6 : vector<1x128xf32> to vector<256x128xf32>
    %8 = arith.addf %5, %7 : vector<256x128xf32>
    %c0_6 = arith.constant 0 : index
    %c0_7 = arith.constant 0 : index
    %c0_8 = arith.constant 0 : index
    %9 = vector.load %arg5[%c0_6, %c0_7, %c0_8] : memref<1x256x128xf32, #tpu.memory_space<vmem>>, vector<1x256x128xf32>
    %10 = vector.shape_cast %9 : vector<1x256x128xf32> to vector<256x128xf32>
    %11 = vector.shape_cast %8 : vector<256x128xf32> to vector<1x256x128xf32>
    tpu.vector_store %arg5[%c0_6, %c0_7, %c0_8], %11 {strides = array<i32>} : memref<1x256x128xf32, #tpu.memory_space<vmem>>, vector<1x256x128xf32>,
    return
  }
  func.func @transform_0(%arg0: i32, %arg1: i32) -> (i32, i32, i32) {
    %c0_i32 = arith.constant 0 : i32
    %c0_i32_0 = arith.constant 0 : i32
    return %arg0, %c0_i32, %arg1 : i32, i32, i32
  }
  func.func @transform_1(%arg0: i32, %arg1: i32) -> (i32, i32) {
    %c0_i32 = arith.constant 0 : i32
    %c0_i32_0 = arith.constant 0 : i32
    %c0_i32_1 = arith.constant 0 : i32
    return %c0_i32, %c0_i32_0 : i32, i32
  }
  func.func @transform_2(%arg0: i32, %arg1: i32) -> (i32, i32) {
    %c0_i32 = arith.constant 0 : i32
    %c0_i32_0 = arith.constant 0 : i32
    %c0_i32_1 = arith.constant 0 : i32
    return %c0_i32, %c0_i32_0 : i32, i32
  }
  func.func @transform_3(%arg0: i32, %arg1: i32) -> (i32, i32, i32) {
    %c0_i32 = arith.constant 0 : i32
    %c0_i32_0 = arith.constant 0 : i32
    return %arg0, %arg1, %c0_i32 : i32, i32, i32
  }
}

</mosaic_0001>

<bundles_post_ra>
// kernel: tpu_custom_call.1
= control target key start
LH: loop header
LB: loop body
LE: loop exit
PB: predicated region body
PF: predicated region fallthrough
CT: control target
= control target key end

     0   :  { %8 = vsyncpa [#allocation3], 0  ;;  %s1906_s0 = inlined_call_operand.hbm [shape: f32[2,256,256], index: 0, kind: input, shape index: {}]   ;;  %s1907_s1 = inlined_call_operand.hbm [shape: bf16[256,128], index: 1, kind: input, shape index: {}]   ;;  %s1908_s2 = inlined_call_operand.vmem [shape: f32[1,128], index: 2, kind: input, shape index: {}]   ;;  %s1909_s3 = inlined_call_operand.hbm [shape: f32[2,256,128], index: 3, kind: output, shape index: {}]  }
   0x1   :  { %10 = vsyncpa [#allocation3 + $0x1], 0 }
   0x2   :  { %11 = vsyncpa [#allocation6], 0 }
   0x3   :  { %12 = vsyncpa [#allocation4], 0 }
   0x4   :  { %14 = vsyncpa [#allocation4 + $0x1], 0  ;;  %s1548_s12 = smov 0   ;;  %s1550_s13 = smov 0  }
   0x5   :  { %s1552_s14 = smov 0   ;;  %s1554_s15 = smov 0  }
   0x6   :  { %s1556_s16 = smov 0   ;;  %s1558_s17 = smov 0  }
   0x7 LB: > { %s890_s18 = sadd.s32 4294967295, %s1517_s17   ;;  %s891_s19 = sadd.s32 4294967294, %s1517_s17   ;;  %s1517_s17 = sphi %s1558_s17, %s20_s17   ;;  %s1513_s16 = sphi %s1556_s16, %s1933_s16   ;;  %s1509_s15 = sphi %s1554_s15, %s1932_s15   ;;  %s1505_s14 = sphi %s1552_s14, %s1931_s14   ;;  %s1501_s13 = sphi %s1550_s13, %s1930_s13   ;;  %s1497_s12 = sphi %s1548_s12, %s1929_s12  }
   0x8   : > { %p54_p0 = scmp.ne.s32.totalorder %s1501_s13, %s1497_s12  ;;  %p1582_p1 = scmp.eq.s32.totalorder %s890_s18, 0 }
   0x9   : > { %p1586_p2 = scmp.eq.s32.totalorder %s890_s18, 1  ;;  %p128_p3 = scmp.eq.s32.totalorder %s891_s19, 1 }
   0xa   : > { %s1914_s20 = scalar_select %p1582_p1, 1, 0 }
   0xb   : > { %s1915_s21 = scalar_select %p1586_p2, 1, 0 }
   0xc   : > { %p1592_p4 = por %p1582_p1, %p54_p0  ;;  %p892_p5 = scmp.ge.s32.totalorder %s1517_s17, 1 }
   0xd   : > { %p1597_p6 = por %p128_p3, %p54_p0  ;;  %p135_p7 = scmp.lt.s32.totalorder %s1517_s17, 3 }
   0xe   : > { %s1916_s22 = scalar_select %p1592_p4, 1, 0 }
   0xf   : > { %s1917_s23 = scalar_select %p1597_p6, 1, 0 }
  0x10   : > { %p1602_p8 = pnand %p892_p5, %p135_p7  ;;  %s1519_s25 = smov [#allocation5]  }
  0x11   : > { %s147_s26 = sshll.u32 %s1519_s25, 4  ;;  %s32_s28 = sadd.s32 1, %s1513_s16  ;;  %s148_s26 = int_to_ptr.vmem [resolvable:$true] %s147_s26 }
  0x12   : > { %s1918_s24 = scalar_select %p1602_p8, 1, 0 }
  0x13   : > { %p1062_p9 = pneg %p1602_p8  ;;  %s1373_s4 = scalar_lea.hbm %s1907_s1, 2048 }
  0x14   : > { %p1374_p12 = scmp.ne.s32.totalorder %s1907_s1, %s1373_s4  ;;  %p1380_p5 = scmp.lt.u32.totalorder %s1373_s4, %s1907_s1 }
  0x15   : > { %p1611_p11 = pnand %p1062_p9, %p1582_p1 }
  0x17   : > { %p1375_p13 = pneg %p1611_p11 }
  0x19   : > { %p1376_p0 = pnand %p1375_p13, %p1374_p12 }
  0x1b   : > { %p1377_p3 = pneg %p1376_p0 }
  0x1d   : > { %p1382_p7 = pnand %p1380_p5, %p1377_p3 }
  0x1f   : > { %1385 = shalt.err (!%p1382_p7)
}
  0x20   : > { %s1386_s9 = scalar_lea.vmem %s148_s26, 2048  ;;  %p1394_p1 = scmp.lt.s32.totalorder %s148_s26, %s148_s26 }
  0x21   : > { %p1387_p9 = scmp.ne.s32.totalorder %s148_s26, %s1386_s9  ;;  %p1395_p4 = scmp.lt.s32.totalorder %s1386_s9, %s1386_s9 }
  0x23   : > { %p1389_p10 = pnand %p1387_p9, %p1375_p13  ;;  %p1396_p8 = por %p1395_p4, %p1394_p1 }
  0x25   : > { %p1390_p6 = pneg %p1389_p10 }
  0x27   : > { %p1397_p2 = pnand %p1396_p8, %p1390_p6 }
  0x29   : > { %1400 = shalt.err (!%p1397_p2)
}
  0x2a   : > { %s1520_s10 = smov 64   ;;  %s1521_s11 = smov 4  }
  0x2b   : > { %1065 = dma.hbm_to_vmem [thread:$0]  (!%p1611_p11), %s1907_s1, 2048, %s148_s26, [#allocation6], %s1520_s10, %s1520_s10, %s1521_s11  }
  0x2c   : > { %p34_p1 = scmp.ge.s32.totalorder %s32_s28, 2  ;;  %s41_s25 = sadd.s32 1, %s1505_s14 }
  0x2d   : > { %p48_p2 = scmp.ne.s32.totalorder %s1505_s14, %s1501_s13  ;;  %p49_p4 = scmp.eq.s32.totalorder %s1517_s17, 0 }
  0x2e   : > { %s1935_s28 = smov (%p34_p1, %s32_s28), 0  ;;  %p1921_p8 = scmp.ne.s32.totalorder %s1915_s21, 0 }
  0x2f   : > { %p1638_p6 = por %p49_p4, %p48_p2  ;;  %s36_s27 = ssub.s32 %s1513_s16, %s1935_s28 }
  0x30   : > { %p1644_p10 = por %p1921_p8, %p48_p2  ;;  %p1075_p12 = scmp.lt.s32.totalorder %s1517_s17, 2 }
  0x31   : > { %p39_p11 = scmp.eq.s32.totalorder %s36_s27, 0  ;;  %s164_s26 = sand.u32 1, %s1505_s14  }
  0x32   : > { %s895_s4 = sshll.u32 %s164_s26, 9  ;;  %s924_s6 = sshll.u32 %s1513_s16, 13 }
  0x33   : > { %s1653_s5 = scalar_select %p39_p11, %s1505_s14, %s41_s25  }
  0x34   : > { %s1659_s9 = scalar_lea.hbm %s1906_s0, %s924_s6  ;;  %s168_s21 = scalar_lea.vmem [#allocation2], %s895_s4 }
  0x35   : > { %s177_s10 = sshll.u32 %s168_s21, 4  ;;  %p1665_p13 = pnand %p1075_p12, %p1638_p6  ;;  %s1661_s10 = int_to_ptr.vmem [resolvable:$true] %s177_s10 }
  0x36   : > { %s1669_s18 = scalar_lea.sflag [#allocation3], %s164_s26  ;;  %s1401_s19 = scalar_lea.hbm %s1659_s9, 8192 }
  0x37   : > { %p1402_p0 = scmp.ne.s32.totalorder %s1659_s9, %s1401_s19  ;;  %p1403_p3 = pneg %p1665_p13 }
  0x38   : > { %s1406_s29 = scalar_lea.hbm %s1906_s0, 16384  ;;  %p1407_p9 = scmp.lt.u32.totalorder %s1659_s9, %s1906_s0 }
  0x39   : > { %p1404_p5 = pnand %p1403_p3, %p1402_p0  ;;  %p1408_p1 = scmp.lt.u32.totalorder %s1406_s29, %s1401_s19 }
  0x3a   : > { %p1410_p4 = scmp.lt.u32.totalorder %s1401_s19, %s1659_s9 }
  0x3b   : > { %p1405_p7 = pneg %p1404_p5  ;;  %p1409_p2 = por %p1408_p1, %p1407_p9 }
  0x3d   : > { %p1411_p6 = por %p1410_p4, %p1409_p2 }
  0x3f   : > { %p1412_p8 = pnand %p1411_p6, %p1405_p7 }
  0x41   : > { %1415 = shalt.err (!%p1412_p8)
}
  0x42   : > { %s1416_s26 = scalar_lea.vmem %s1661_s10, 8192  ;;  %s1522_s7 = smov [#allocation2]  }
  0x43   : > { %p1417_p12 = scmp.ne.s32.totalorder %s1661_s10, %s1416_s26  ;;  %s1421_s8 = sshll.u32 %s1522_s7, 4  ;;  %s1422_s8 = int_to_ptr.vmem [resolvable:$false] %s1421_s8 }
  0x44   : > { %s1423_s21 = scalar_lea.vmem %s1422_s8, 16384  ;;  %p1424_p5 = scmp.lt.s32.totalorder %s1661_s10, %s1422_s8 }
  0x45   : > { %p1419_p11 = pnand %p1417_p12, %p1403_p3  ;;  %p1425_p9 = scmp.lt.s32.totalorder %s1423_s21, %s1416_s26 }
  0x47   : > { %p1420_p0 = pneg %p1419_p11  ;;  %p1426_p1 = por %p1425_p9, %p1424_p5 }
  0x49   : > { %p1427_p2 = pnand %p1426_p1, %p1420_p0 }
  0x4b   : > { %1430 = shalt.err (!%p1427_p2)
}
  0x4c   : > { %s1523_s19 = smov 256   ;;  %s1524_s25 = smov 16  }
  0x4d   : > { %1069 = dma.hbm_to_vmem [thread:$0]  (!%p1665_p13), %s1659_s9, 8192, %s1661_s10, %s1669_s18, %s1523_s19, %s1523_s19, %s1524_s25  }
  0x4e   : > { %p1924_p3 = scmp.ne.s32.totalorder %s1918_s24, 0 }
  0x4f   : > { %s1700_s27 = sand.u32 (!%p1924_p3), 1, %s1501_s13   ;;  %p1925_p7 = scmp.ne.s32.totalorder (!%p1924_p3), %s1916_s22, 0 }
  0x50   : > { %189 = sbr.rel (%p1924_p3) target bundleno = 522 (0x20a), region = 32  ;;  %s899_s29 = sshll.u32 (!%p1924_p3), %s1700_s27, 9 }
  0x51   : > { %s192_s4 = scalar_lea.sflag (!%p1924_p3), [#allocation3], %s1700_s27  ;;  %s1704_s6 = scalar_lea.vmem (!%p1924_p3), [#allocation2], %s899_s29 }
  0x57   : > { %1484 = dma.done.wait (%p1925_p7), %s192_s4, 8192  }
  0x58   : > { %1486 = vsyncadd (%p1925_p7), %s192_s4, 4294959104  ;;  %p1926_p13 = scmp.ne.s32.totalorder %s1914_s20, 0 }
  0x5a   : > { %1488 = dma.done.wait (%p1926_p13), [#allocation6], 2048  }
  0x5b   : > { %1490 = vsyncadd (%p1926_p13), [#allocation6], 4294965248  ;;  %v257_v0 = vld [vmem:[%s1704_s6 + $0x100] sm:$0xff]  ;;  %v258_v1 = vld [vmem:[%s1704_s6 + $0x108] sm:$0xff]  ;;  %s901_s20 = sshll.u32 %s1700_s27, 8  ;;  %s925_s10 = sshll.u32 %s1509_s15, 12 }
  0x5c   : > { %v225_v2 = vld [vmem:[%s1704_s6] sm:$0xff]  ;;  %v1133_v3 = vpack.i.bf16 %v258_v1, %v257_v0  ;;  %v226_v4 = vld [vmem:[%s1704_s6 + $0x8] sm:$0xff]  ;;  %v259_v5 = vld [vmem:[%s1704_s6 + $0x110] sm:$0xff]  ;;  %s1786_s9 = scalar_lea.vmem [#allocation7], %s901_s20  ;;  %s1849_s7 = scalar_lea.hbm %s1909_s3, %s925_s10 }
  0x5d   : > { %v260_v6 = vld [vmem:[%s1704_s6 + $0x118] sm:$0xff]  ;;  %v1245_v7 = vpack.i.bf16 %v226_v4, %v225_v2  ;;  %v227_v8 = vld [vmem:[%s1704_s6 + $0x10] sm:$0xff]  ;;  %v261_v12 = vld [vmem:[%s1704_s6 + $0x120] sm:$0xff]  ;;  %s793_s11 = sshll.u32 %s1786_s9, 4  ;;  %s778_s15 = scalar_lea.sflag [#allocation4], %s1700_s27  ;;  %s1851_s11 = int_to_ptr.vmem [resolvable:$true] %s793_s11 }
  0x5e   : > { %v228_v9 = vld [vmem:[%s1704_s6 + $0x18] sm:$0xff]  ;;  %1134 = vxpose.xlu0.b32.start [1/16] %v1133_v3, 128  ;;  %v1135_v10 = vpack.i.bf16 %v260_v6, %v259_v5  ;;  %v262_v13 = vld [vmem:[%s1704_s6 + $0x128] sm:$0xff]  ;;  %v229_v14 = vld [vmem:[%s1704_s6 + $0x20] sm:$0xff]  ;;  %s1431_s8 = scalar_lea.vmem %s1851_s11, 4096  ;;  %s1525_s21 = smov [#allocation7]  }
  0x5f   : > { %1246 = vxpose.xlu1.b32.start [1/16] %v1245_v7, 128  ;;  %v1247_v11 = vpack.i.bf16 %v228_v9, %v227_v8  ;;  %v230_v15 = vld [vmem:[%s1704_s6 + $0x28] sm:$0xff]  ;;  %v1137_v16 = vpack.i.bf16 %v262_v13, %v261_v12  ;;  %v263_v18 = vld [vmem:[%s1704_s6 + $0x130] sm:$0xff]  ;;  %v264_v19 = vld [vmem:[%s1704_s6 + $0x138] sm:$0xff]  ;;  %p1432_p4 = scmp.ne.s32.totalorder %s1851_s11, %s1431_s8  ;;  %s1435_s19 = sshll.u32 %s1525_s21, 4  ;;  %s1436_s19 = int_to_ptr.vmem [resolvable:$false] %s1435_s19 }
  0x60   : > { %v1249_v17 = vpack.i.bf16 %v230_v15, %v229_v14  ;;  %v231_v20 = vld [vmem:[%s1704_s6 + $0x30] sm:$0xff]  ;;  %v232_v21 = vld [vmem:[%s1704_s6 + $0x38] sm:$0xff]  ;;  %v1139_v22 = vpack.i.bf16 %v264_v19, %v263_v18  ;;  %v265_v24 = vld [vmem:[%s1704_s6 + $0x140] sm:$0xff]  ;;  %s1437_s25 = scalar_lea.vmem %s1436_s19, 8192  ;;  %p1438_p12 = scmp.lt.s32.totalorder %s1851_s11, %s1436_s19 }
  0x61   : > { %v1251_v23 = vpack.i.bf16 %v232_v21, %v231_v20  ;;  %v266_v25 = vld [vmem:[%s1704_s6 + $0x148] sm:$0xff]  ;;  %v233_v26 = vld [vmem:[%s1704_s6 + $0x40] sm:$0xff]  ;;  %v267_v30 = vld [vmem:[%s1704_s6 + $0x150] sm:$0xff]  ;;  %p1433_p6 = pnand %p1432_p4, %p1644_p10  ;;  %p1439_p11 = scmp.lt.s32.totalorder %s1437_s25, %s1431_s8 }
  0x62   : > { %1136 = vxpose.xlu0.b32.cont [2/16] %v1135_v10, 128  ;;  %v234_v27 = vld [vmem:[%s1704_s6 + $0x48] sm:$0xff]  ;;  %v1141_v28 = vpack.i.bf16 %v266_v25, %v265_v24  ;;  %v268_v31 = vld [vmem:[%s1704_s6 + $0x158] sm:$0xff]  ;;  %v235_v32 = vld [vmem:[%s1704_s6 + $0x50] sm:$0xff] }
  0x63   : > { %1248 = vxpose.xlu1.b32.cont [2/16] %v1247_v11, 128  ;;  %v1253_v29 = vpack.i.bf16 %v234_v27, %v233_v26  ;;  %v236_v33 = vld [vmem:[%s1704_s6 + $0x58] sm:$0xff]  ;;  %v1143_v34 = vpack.i.bf16 %v268_v31, %v267_v30  ;;  %v269_v36 = vld [vmem:[%s1704_s6 + $0x160] sm:$0xff]  ;;  %v270_v37 = vld [vmem:[%s1704_s6 + $0x168] sm:$0xff]  ;;  %p1434_p8 = pneg %p1433_p6  ;;  %p1440_p0 = por %p1439_p11, %p1438_p12 }
  0x64   : > { %v1255_v35 = vpack.i.bf16 %v236_v33, %v235_v32  ;;  %v237_v38 = vld [vmem:[%s1704_s6 + $0x60] sm:$0xff]  ;;  %v238_v39 = vld [vmem:[%s1704_s6 + $0x68] sm:$0xff]  ;;  %v271_v40 = vld [vmem:[%s1704_s6 + $0x170] sm:$0xff]  ;;  %v1145_v43 = vpack.i.bf16 %v270_v37, %v269_v36 }
  0x65   : > { %v272_v41 = vld [vmem:[%s1704_s6 + $0x178] sm:$0xff]  ;;  %v1357_v42 = vld [vmem:[#allocation5 + $0x40] sm:$0xff]   ;;  %v239_v44 = vld [vmem:[%s1704_s6 + $0x70] sm:$0xff]  ;;  %v1257_v47 = vpack.i.bf16 %v238_v39, %v237_v38  ;;  %p1441_p5 = pnand %p1440_p0, %p1434_p8 }
  0x66   : > { %1138 = vxpose.xlu0.b32.cont [3/16] %v1137_v16, 128  ;;  %v240_v45 = vld [vmem:[%s1704_s6 + $0x78] sm:$0xff]  ;;  %v1358_v46 = vld [vmem:[#allocation5] sm:$0xff]   ;;  %926 = vmatprep.subr.bf16.mxu0 %v1357_v42  ;;  %v1359_v48 = vld [vmem:[#allocation5 + $0x48] sm:$0xff]   ;;  %v1147_v53 = vpack.i.bf16 %v272_v41, %v271_v40 }
  0x67   : > { %1250 = vxpose.xlu1.b32.cont [3/16] %v1249_v17, 128  ;;  %1038 = vmatprep.subr.bf16.mxu1 %v1357_v42  ;;  %v1360_v49 = vld [vmem:[#allocation5 + $0x8] sm:$0xff]   ;;  %v273_v50 = vld [vmem:[%s1704_s6 + $0x180] sm:$0xff]  ;;  %v1361_v52 = vld [vmem:[#allocation5 + $0x50] sm:$0xff]   ;;  %v1259_v55 = vpack.i.bf16 %v240_v45, %v239_v44 }
  0x68   : > { %927 = vmatpush3.bf16.msra.mxu0 %v1358_v46  ;;  %v274_v51 = vld [vmem:[%s1704_s6 + $0x188] sm:$0xff]  ;;  %1046 = vmatpush3.bf16.msra.mxu1 %v1358_v46  ;;  %v241_v54 = vld [vmem:[%s1704_s6 + $0x80] sm:$0xff]  ;;  %v1362_v57 = vld [vmem:[#allocation5 + $0x10] sm:$0xff]  }
  0x69   : > { %928 = vmatprep.subr.bf16.mxu0 %v1359_v48  ;;  %1039 = vmatprep.subr.bf16.mxu1 %v1359_v48  ;;  %v242_v56 = vld [vmem:[%s1704_s6 + $0x88] sm:$0xff]  ;;  %v275_v58 = vld [vmem:[%s1704_s6 + $0x190] sm:$0xff]  ;;  %v276_v59 = vld [vmem:[%s1704_s6 + $0x198] sm:$0xff]  ;;  %v1149_v61 = vpack.i.bf16 %v274_v51, %v273_v50 }
  0x6a   : > { %1140 = vxpose.xlu0.b32.cont [4/16] %v1139_v22, 128  ;;  %v1363_v60 = vld [vmem:[#allocation5 + $0x58] sm:$0xff]   ;;  %v243_v62 = vld [vmem:[%s1704_s6 + $0x90] sm:$0xff]  ;;  %v1261_v63 = vpack.i.bf16 %v242_v56, %v241_v54  ;;  %v1365_v2 = vld [vmem:[#allocation5 + $0x60] sm:$0xff]   ;;  %v1151_v3 = vpack.i.bf16 %v276_v59, %v275_v58 }
  0x6b   : > { %1252 = vxpose.xlu1.b32.cont [4/16] %v1251_v23, 128  ;;  %v244_v0 = vld [vmem:[%s1704_s6 + $0x98] sm:$0xff]  ;;  %v277_v4 = vld [vmem:[%s1704_s6 + $0x1a0] sm:$0xff]  ;;  %v278_v6 = vld [vmem:[%s1704_s6 + $0x1a8] sm:$0xff] }
  0x6c   : > { %929 = vmatpush3.bf16.msra.mxu0 %v1360_v49  ;;  %1047 = vmatpush3.bf16.msra.mxu1 %v1360_v49  ;;  %v1364_v1 = vld [vmem:[#allocation5 + $0x18] sm:$0xff]   ;;  %v1263_v5 = vpack.i.bf16 %v244_v0, %v243_v62  ;;  %v245_v7 = vld [vmem:[%s1704_s6 + $0xa0] sm:$0xff]  ;;  %v246_v8 = vld [vmem:[%s1704_s6 + $0xa8] sm:$0xff]  ;;  %v1153_v11 = vpack.i.bf16 %v278_v6, %v277_v4 }
  0x6d   : > { %930 = vmatprep.subr.bf16.mxu0 %v1361_v52  ;;  %1040 = vmatprep.subr.bf16.mxu1 %v1361_v52  ;;  %v1366_v9 = vld [vmem:[#allocation5 + $0x20] sm:$0xff]   ;;  %v1367_v10 = vld [vmem:[#allocation5 + $0x68] sm:$0xff]   ;;  %v1265_v12 = vpack.i.bf16 %v246_v8, %v245_v7  ;;  %v279_v13 = vld [vmem:[%s1704_s6 + $0x1b0] sm:$0xff] }
  0x6e   : > { %1142 = vxpose.xlu0.b32.cont [5/16] %v1141_v28, 128  ;;  %v280_v14 = vld [vmem:[%s1704_s6 + $0x1b8] sm:$0xff]  ;;  %v247_v15 = vld [vmem:[%s1704_s6 + $0xb0] sm:$0xff]  ;;  %v1368_v17 = vld [vmem:[#allocation5 + $0x28] sm:$0xff]  }
  0x6f   : > { %1254 = vxpose.xlu1.b32.cont [5/16] %v1253_v29, 128  ;;  %v248_v16 = vld [vmem:[%s1704_s6 + $0xb8] sm:$0xff]  ;;  %v1369_v18 = vld [vmem:[#allocation5 + $0x70] sm:$0xff]   ;;  %v1155_v19 = vpack.i.bf16 %v280_v14, %v279_v13  ;;  %v281_v21 = vld [vmem:[%s1704_s6 + $0x1c0] sm:$0xff] }
  0x70   : > { %931 = vmatpush3.bf16.msra.mxu0 %v1362_v57  ;;  %1048 = vmatpush3.bf16.msra.mxu1 %v1362_v57  ;;  %v1267_v20 = vpack.i.bf16 %v248_v16, %v247_v15  ;;  %v282_v22 = vld [vmem:[%s1704_s6 + $0x1c8] sm:$0xff]  ;;  %v249_v23 = vld [vmem:[%s1704_s6 + $0xc0] sm:$0xff]  ;;  %v1370_v25 = vld [vmem:[#allocation5 + $0x30] sm:$0xff]  }
  0x71   : > { %932 = vmatprep.subr.bf16.mxu0 %v1363_v60  ;;  %1041 = vmatprep.subr.bf16.mxu1 %v1363_v60  ;;  %v250_v24 = vld [vmem:[%s1704_s6 + $0xc8] sm:$0xff]  ;;  %v1371_v26 = vld [vmem:[#allocation5 + $0x78] sm:$0xff]   ;;  %v1157_v27 = vpack.i.bf16 %v282_v22, %v281_v21  ;;  %v283_v29 = vld [vmem:[%s1704_s6 + $0x1d0] sm:$0xff] }
  0x72   : > { %1144 = vxpose.xlu0.b32.cont [6/16] %v1143_v34, 128  ;;  %v1269_v28 = vpack.i.bf16 %v250_v24, %v249_v23  ;;  %v284_v30 = vld [vmem:[%s1704_s6 + $0x1d8] sm:$0xff]  ;;  %v251_v31 = vld [vmem:[%s1704_s6 + $0xd0] sm:$0xff]  ;;  %v285_v36 = vld [vmem:[%s1704_s6 + $0x1e0] sm:$0xff] }
  0x73   : > { %1256 = vxpose.xlu1.b32.cont [6/16] %v1255_v35, 128  ;;  %v252_v32 = vld [vmem:[%s1704_s6 + $0xd8] sm:$0xff]  ;;  %v1159_v34 = vpack.i.bf16 %v284_v30, %v283_v29  ;;  %v286_v37 = vld [vmem:[%s1704_s6 + $0x1e8] sm:$0xff]  ;;  %v253_v38 = vld [vmem:[%s1704_s6 + $0xe0] sm:$0xff] }
  0x74   : > { %933 = vmatpush3.bf16.msra.mxu0 %v1364_v1  ;;  %1049 = vmatpush3.bf16.msra.mxu1 %v1364_v1  ;;  %v1372_v33 = vld [vmem:[#allocation5 + $0x38] sm:$0xff]   ;;  %v1271_v35 = vpack.i.bf16 %v252_v32, %v251_v31  ;;  %v254_v39 = vld [vmem:[%s1704_s6 + $0xe8] sm:$0xff]  ;;  %v1161_v40 = vpack.i.bf16 %v286_v37, %v285_v36  ;;  %v287_v42 = vld [vmem:[%s1704_s6 + $0x1f0] sm:$0xff] }
  0x75   : > { %934 = vmatprep.subr.bf16.mxu0 %v1365_v2  ;;  %1042 = vmatprep.subr.bf16.mxu1 %v1365_v2  ;;  %v1273_v41 = vpack.i.bf16 %v254_v39, %v253_v38  ;;  %v255_v44 = vld [vmem:[%s1704_s6 + $0xf0] sm:$0xff]  ;;  %v256_v45 = vld [vmem:[%s1704_s6 + $0xf8] sm:$0xff] }
  0x76   : > { %1146 = vxpose.xlu0.b32.cont [7/16] %v1145_v43, 128  ;;  %v288_v43 = vld [vmem:[%s1704_s6 + $0x1f8] sm:$0xff] }
  0x77   : > { %1258 = vxpose.xlu1.b32.cont [7/16] %v1257_v47, 128  ;;  %v1163_v46 = vpack.i.bf16 %v288_v43, %v287_v42  ;;  %v1275_v47 = vpack.i.bf16 %v256_v45, %v255_v44 }
  0x78   : > { %935 = vmatpush3.bf16.msra.mxu0 %v1366_v9  ;;  %1050 = vmatpush3.bf16.msra.mxu1 %v1366_v9 }
  0x79   : > { %936 = vmatprep.subr.bf16.mxu0 %v1367_v10  ;;  %1043 = vmatprep.subr.bf16.mxu1 %v1367_v10 }
  0x7a   : > { %1148 = vxpose.xlu0.b32.cont [8/16] %v1147_v53, 128 }
  0x7b   : > { %1260 = vxpose.xlu1.b32.cont [8/16] %v1259_v55, 128 }
  0x7c   : > { %937 = vmatpush3.bf16.msra.mxu0 %v1368_v17  ;;  %1051 = vmatpush3.bf16.msra.mxu1 %v1368_v17 }
  0x7d   : > { %938 = vmatprep.subr.bf16.mxu0 %v1369_v18  ;;  %1044 = vmatprep.subr.bf16.mxu1 %v1369_v18 }
  0x7e   : > { %1150 = vxpose.xlu0.b32.cont [9/16] %v1149_v61, 128 }
  0x7f   : > { %1262 = vxpose.xlu1.b32.cont [9/16] %v1261_v63, 128 }
  0x80   : > { %939 = vmatpush3.bf16.msra.mxu0 %v1370_v25  ;;  %1052 = vmatpush3.bf16.msra.mxu1 %v1370_v25 }
  0x81   : > { %940 = vmatprep.subr.bf16.mxu0 %v1371_v26  ;;  %1045 = vmatprep.subr.bf16.mxu1 %v1371_v26 }
  0x82   : > { %1152 = vxpose.xlu0.b32.cont [10/16] %v1151_v3, 128 }
  0x83   : > { %1264 = vxpose.xlu1.b32.cont [10/16] %v1263_v5, 128 }
  0x84   : > { %941 = vmatpush3.bf16.msra.mxu0 %v1372_v33  ;;  %1053 = vmatpush3.bf16.msra.mxu1 %v1372_v33 }
  0x86   : > { %1154 = vxpose.xlu0.b32.cont [11/16] %v1153_v11, 128 }
  0x87   : > { %1266 = vxpose.xlu1.b32.cont [11/16] %v1265_v12, 128 }
  0x8a   : > { %1156 = vxpose.xlu0.b32.cont [12/16] %v1155_v19, 128 }
  0x8b   : > { %1268 = vxpose.xlu1.b32.cont [12/16] %v1267_v20, 128 }
  0x8e   : > { %1158 = vxpose.xlu0.b32.cont [13/16] %v1157_v27, 128 }
  0x8f   : > { %1270 = vxpose.xlu1.b32.cont [13/16] %v1269_v28, 128 }
  0x92   : > { %1160 = vxpose.xlu0.b32.cont [14/16] %v1159_v34, 128 }
  0x93   : > { %1272 = vxpose.xlu1.b32.cont [14/16] %v1271_v35, 128 }
  0x96   : > { %1162 = vxpose.xlu0.b32.cont [15/16] %v1161_v40, 128 }
  0x97   : > { %1274 = vxpose.xlu1.b32.cont [15/16] %v1273_v41, 128 }
  0x9a   : > { %1164 = vxpose.xlu0.b32.end [16/16] %v1163_v46, 128 }
  0x9b   : > { %1276 = vxpose.xlu1.b32.end [16/16] %v1275_v47, 128 }
  0xde   : > { %v1165_v48 = vpop.trf.xlu0 }
  0xdf   : > { %v1277_v49 = vpop.trf.xlu1  ;;  %v1166_v53 = vunpack.i.l.bf16 %v1165_v48  ;;  %v1169_v54 = vunpack.i.h.bf16 %v1165_v48 }
  0xe0   : > { %v1281_v50 = vunpack.i.h.bf16 %v1277_v49  ;;  %v1278_v51 = vunpack.i.l.bf16 %v1277_v49 }
  0xe2   : > { %v1170_v52 = vpop.trf.xlu0 }
  0xe3   : > { %v1282_v55 = vpop.trf.xlu1  ;;  %v1171_v56 = vunpack.i.l.bf16 %v1170_v52  ;;  %v1174_v57 = vunpack.i.h.bf16 %v1170_v52 }
  0xe4   : > { %v1286_v58 = vunpack.i.h.bf16 %v1282_v55  ;;  %v1283_v59 = vunpack.i.l.bf16 %v1282_v55 }
  0xe5   : > { %v418_v60 = vpack.c.bf16 %v1171_v56, %v1166_v53  ;;  %v434_v61 = vpack.c.bf16 %v1174_v57, %v1169_v54 }
  0xe6   : > { %v1175_v62 = vpop.trf.xlu0  ;;  %v417_v63 = vpack.c.bf16 %v1283_v59, %v1278_v51  ;;  %v433_v0 = vpack.c.bf16 %v1286_v58, %v1281_v50 }
  0xe7   : > { %v1287_v1 = vpop.trf.xlu1  ;;  %616 = vmatprep.mubr.bf16.mxu0 %v418_v60  ;;  %680 = vmatprep.mubr.bf16.mxu1 %v434_v61  ;;  %v1179_v2 = vunpack.i.h.bf16 %v1175_v62  ;;  %v1176_v3 = vunpack.i.l.bf16 %v1175_v62 }
  0xe8   : > { %617 = vmatmul.mubr.bf16.vlgmr.msra.gmra.mrb[0].mxu0 %v417_v63  ;;  %681 = vmatmul.mubr.bf16.vlgmr.msra.gmra.mrb[0].mxu1 %v433_v0  ;;  %v1291_v4 = vunpack.i.h.bf16 %v1287_v1  ;;  %v1288_v5 = vunpack.i.l.bf16 %v1287_v1 }
  0xea   : > { %v1180_v6 = vpop.trf.xlu0 }
  0xeb   : > { %v1184_v7 = vunpack.i.h.bf16 %v1180_v6  ;;  %v1181_v8 = vunpack.i.l.bf16 %v1180_v6  ;;  %v1292_v9 = vpop.trf.xlu1 }
  0xec   : > { %v1296_v10 = vunpack.i.h.bf16 %v1292_v9  ;;  %v1293_v11 = vunpack.i.l.bf16 %v1292_v9 }
  0xed   : > { %v420_v12 = vpack.c.bf16 %v1181_v8, %v1176_v3  ;;  %v436_v13 = vpack.c.bf16 %v1184_v7, %v1179_v2 }
  0xee   : > { %v1185_v14 = vpop.trf.xlu0  ;;  %v419_v15 = vpack.c.bf16 %v1293_v11, %v1288_v5  ;;  %v435_v16 = vpack.c.bf16 %v1296_v10, %v1291_v4 }
  0xef   : > { %v1297_v17 = vpop.trf.xlu1  ;;  %624 = vmatprep.mubr.bf16.mxu0 %v420_v12  ;;  %688 = vmatprep.mubr.bf16.mxu1 %v436_v13  ;;  %v1189_v18 = vunpack.i.h.bf16 %v1185_v14  ;;  %v1186_v19 = vunpack.i.l.bf16 %v1185_v14 }
  0xf0   : > { %625 = vmatmul.mubr.bf16.gmra.mrb[4].mxu0 %v419_v15  ;;  %689 = vmatmul.mubr.bf16.gmra.mrb[4].mxu1 %v435_v16  ;;  %v1301_v20 = vunpack.i.h.bf16 %v1297_v17  ;;  %v1298_v21 = vunpack.i.l.bf16 %v1297_v17 }
  0xf2   : > { %v1190_v22 = vpop.trf.xlu0 }
  0xf3   : > { %v1194_v23 = vunpack.i.h.bf16 %v1190_v22  ;;  %v1191_v24 = vunpack.i.l.bf16 %v1190_v22  ;;  %v1302_v25 = vpop.trf.xlu1 }
  0xf4   : > { %v1306_v26 = vunpack.i.h.bf16 %v1302_v25  ;;  %v1303_v27 = vunpack.i.l.bf16 %v1302_v25 }
  0xf5   : > { %v422_v28 = vpack.c.bf16 %v1191_v24, %v1186_v19  ;;  %v438_v29 = vpack.c.bf16 %v1194_v23, %v1189_v18 }
  0xf6   : > { %v1195_v30 = vpop.trf.xlu0  ;;  %v421_v31 = vpack.c.bf16 %v1303_v27, %v1298_v21  ;;  %v437_v32 = vpack.c.bf16 %v1306_v26, %v1301_v20 }
  0xf7   : > { %v1307_v33 = vpop.trf.xlu1  ;;  %632 = vmatprep.mubr.bf16.mxu0 %v422_v28  ;;  %696 = vmatprep.mubr.bf16.mxu1 %v438_v29  ;;  %v1199_v34 = vunpack.i.h.bf16 %v1195_v30  ;;  %v1196_v35 = vunpack.i.l.bf16 %v1195_v30 }
  0xf8   : > { %633 = vmatmul.mubr.bf16.gmra.mrb[8].mxu0 %v421_v31  ;;  %697 = vmatmul.mubr.bf16.gmra.mrb[8].mxu1 %v437_v32  ;;  %v1311_v36 = vunpack.i.h.bf16 %v1307_v33  ;;  %v1308_v37 = vunpack.i.l.bf16 %v1307_v33 }
  0xfa   : > { %v1200_v38 = vpop.trf.xlu0 }
  0xfb   : > { %v1204_v39 = vunpack.i.h.bf16 %v1200_v38  ;;  %v1201_v40 = vunpack.i.l.bf16 %v1200_v38  ;;  %v1312_v41 = vpop.trf.xlu1 }
  0xfc   : > { %v1316_v42 = vunpack.i.h.bf16 %v1312_v41  ;;  %v1313_v43 = vunpack.i.l.bf16 %v1312_v41 }
  0xfd   : > { %v424_v44 = vpack.c.bf16 %v1201_v40, %v1196_v35  ;;  %v440_v45 = vpack.c.bf16 %v1204_v39, %v1199_v34 }
  0xfe   : > { %v1205_v46 = vpop.trf.xlu0  ;;  %v423_v47 = vpack.c.bf16 %v1313_v43, %v1308_v37  ;;  %v439_v48 = vpack.c.bf16 %v1316_v42, %v1311_v36 }
  0xff   : > { %v1317_v49 = vpop.trf.xlu1  ;;  %640 = vmatprep.mubr.bf16.mxu0 %v424_v44  ;;  %704 = vmatprep.mubr.bf16.mxu1 %v440_v45  ;;  %v1209_v50 = vunpack.i.h.bf16 %v1205_v46  ;;  %v1206_v51 = vunpack.i.l.bf16 %v1205_v46 }
 0x100   : > { %641 = vmatmul.mubr.bf16.gmra.mrb[12].mxu0 %v423_v47  ;;  %705 = vmatmul.mubr.bf16.gmra.mrb[12].mxu1 %v439_v48  ;;  %v1321_v52 = vunpack.i.h.bf16 %v1317_v49  ;;  %v1318_v53 = vunpack.i.l.bf16 %v1317_v49 }
 0x102   : > { %v1210_v54 = vpop.trf.xlu0 }
 0x103   : > { %v1214_v55 = vunpack.i.h.bf16 %v1210_v54  ;;  %v1211_v56 = vunpack.i.l.bf16 %v1210_v54  ;;  %v1322_v57 = vpop.trf.xlu1 }
 0x104   : > { %v1326_v58 = vunpack.i.h.bf16 %v1322_v57  ;;  %v1323_v59 = vunpack.i.l.bf16 %v1322_v57 }
 0x105   : > { %v426_v60 = vpack.c.bf16 %v1211_v56, %v1206_v51  ;;  %v442_v61 = vpack.c.bf16 %v1214_v55, %v1209_v50  ;;  %v1782_v50 = vld [vmem:[%s1908_s2] ss:$0 sm:$0xff] }
 0x106   : > { %v1215_v62 = vpop.trf.xlu0  ;;  %v425_v63 = vpack.c.bf16 %v1323_v59, %v1318_v53  ;;  %v441_v0 = vpack.c.bf16 %v1326_v58, %v1321_v52 }
 0x107   : > { %v1327_v1 = vpop.trf.xlu1  ;;  %648 = vmatprep.mubr.bf16.mxu0 %v426_v60  ;;  %712 = vmatprep.mubr.bf16.mxu1 %v442_v61  ;;  %v1219_v2 = vunpack.i.h.bf16 %v1215_v62  ;;  %v1216_v3 = vunpack.i.l.bf16 %v1215_v62 }
 0x108   : > { %649 = vmatmul.mubr.bf16.gmra.mrb[16].mxu0 %v425_v63  ;;  %713 = vmatmul.mubr.bf16.gmra.mrb[16].mxu1 %v441_v0  ;;  %v1331_v4 = vunpack.i.h.bf16 %v1327_v1  ;;  %v1328_v5 = vunpack.i.l.bf16 %v1327_v1 }
 0x10a   : > { %v1220_v6 = vpop.trf.xlu0 }
 0x10b   : > { %v1224_v7 = vunpack.i.h.bf16 %v1220_v6  ;;  %v1221_v8 = vunpack.i.l.bf16 %v1220_v6  ;;  %v1332_v9 = vpop.trf.xlu1 }
 0x10c   : > { %v1336_v10 = vunpack.i.h.bf16 %v1332_v9  ;;  %v1333_v11 = vunpack.i.l.bf16 %v1332_v9 }
 0x10d   : > { %v428_v12 = vpack.c.bf16 %v1221_v8, %v1216_v3  ;;  %v444_v13 = vpack.c.bf16 %v1224_v7, %v1219_v2 }
 0x10e   : > { %v1225_v14 = vpop.trf.xlu0  ;;  %v427_v15 = vpack.c.bf16 %v1333_v11, %v1328_v5  ;;  %v443_v16 = vpack.c.bf16 %v1336_v10, %v1331_v4 }
 0x10f   : > { %v1337_v17 = vpop.trf.xlu1  ;;  %656 = vmatprep.mubr.bf16.mxu0 %v428_v12  ;;  %720 = vmatprep.mubr.bf16.mxu1 %v444_v13  ;;  %v1229_v18 = vunpack.i.h.bf16 %v1225_v14  ;;  %v1226_v19 = vunpack.i.l.bf16 %v1225_v14 }
 0x110   : > { %657 = vmatmul.mubr.bf16.gmra.mrb[20].mxu0 %v427_v15  ;;  %721 = vmatmul.mubr.bf16.gmra.mrb[20].mxu1 %v443_v16  ;;  %v1341_v20 = vunpack.i.h.bf16 %v1337_v17  ;;  %v1338_v21 = vunpack.i.l.bf16 %v1337_v17 }
 0x112   : > { %v1230_v22 = vpop.trf.xlu0 }
 0x113   : > { %v1234_v23 = vunpack.i.h.bf16 %v1230_v22  ;;  %v1231_v24 = vunpack.i.l.bf16 %v1230_v22  ;;  %v1342_v25 = vpop.trf.xlu1 }
 0x114   : > { %v1346_v26 = vunpack.i.h.bf16 %v1342_v25  ;;  %v1343_v27 = vunpack.i.l.bf16 %v1342_v25 }
 0x115   : > { %v430_v28 = vpack.c.bf16 %v1231_v24, %v1226_v19  ;;  %v446_v29 = vpack.c.bf16 %v1234_v23, %v1229_v18 }
 0x116   : > { %v1235_v30 = vpop.trf.xlu0  ;;  %v429_v31 = vpack.c.bf16 %v1343_v27, %v1338_v21  ;;  %v445_v32 = vpack.c.bf16 %v1346_v26, %v1341_v20 }
 0x117   : > { %v1347_v33 = vpop.trf.xlu1  ;;  %664 = vmatprep.mubr.bf16.mxu0 %v430_v28  ;;  %728 = vmatprep.mubr.bf16.mxu1 %v446_v29  ;;  %v1239_v34 = vunpack.i.h.bf16 %v1235_v30  ;;  %v1236_v35 = vunpack.i.l.bf16 %v1235_v30 }
 0x118   : > { %665 = vmatmul.mubr.bf16.gmra.mrb[24].mxu0 %v429_v31  ;;  %729 = vmatmul.mubr.bf16.gmra.mrb[24].mxu1 %v445_v32  ;;  %v1351_v36 = vunpack.i.h.bf16 %v1347_v33  ;;  %v1348_v37 = vunpack.i.l.bf16 %v1347_v33 }
 0x11a   : > { %v1240_v38 = vpop.trf.xlu0 }
 0x11b   : > { %v1244_v39 = vunpack.i.h.bf16 %v1240_v38  ;;  %v1241_v40 = vunpack.i.l.bf16 %v1240_v38  ;;  %v1352_v41 = vpop.trf.xlu1 }
 0x11c   : > { %v1356_v42 = vunpack.i.h.bf16 %v1352_v41  ;;  %v1353_v43 = vunpack.i.l.bf16 %v1352_v41 }
 0x11d   : > { %v432_v44 = vpack.c.bf16 %v1241_v40, %v1236_v35  ;;  %v448_v45 = vpack.c.bf16 %v1244_v39, %v1239_v34 }
 0x11e   : > { %v431_v46 = vpack.c.bf16 %v1353_v43, %v1348_v37  ;;  %v447_v47 = vpack.c.bf16 %v1356_v42, %v1351_v36 }
 0x11f   : > { %672 = vmatprep.mubr.bf16.mxu0 %v432_v44  ;;  %736 = vmatprep.mubr.bf16.mxu1 %v448_v45 }
 0x120   : > { %673 = vmatmul.mubr.bf16.gmra.mrb[28].mxu0 %v431_v46  ;;  %737 = vmatmul.mubr.bf16.gmra.mrb[28].mxu1 %v447_v47 }
 0x1bb   : > { %v942_v48 = vpop.f32.mrb[0].mxu0  ;;  %v990_v49 = vpop.f32.mrb[0].mxu1 }
 0x1bc   : > { %v943_v51 = vpop.f32.mrb[1].mxu0  ;;  %v991_v52 = vpop.f32.mrb[1].mxu1 }
 0x1bd   : > { %v944_v53 = vadd.f32 %v943_v51, %v942_v48  ;;  %v992_v54 = vadd.f32 %v991_v52, %v990_v49  ;;  %v945_v55 = vpop.f32.mrb[2].mxu0  ;;  %v993_v56 = vpop.f32.mrb[2].mxu1 }
 0x1be   : > { %v946_v57 = vpop.f32.mrb[3].mxu0  ;;  %v994_v58 = vpop.f32.mrb[3].mxu1 }
 0x1bf   : > { %v619_v59 = vadd.f32 %v944_v53, %v1782_v50  ;;  %v683_v60 = vadd.f32 %v992_v54, %v1782_v50  ;;  %v947_v61 = vadd.f32 %v946_v57, %v945_v55  ;;  %v995_v62 = vadd.f32 %v994_v58, %v993_v56 }
 0x1c1   : > { %745 = vst [vmem:[%s1786_s9] sm:$0xff] %v619_v59  ;;  %761 = vst [vmem:[%s1786_s9 + $0x80] sm:$0xff] %v683_v60  ;;  %v622_v63 = vadd.f32 %v947_v61, %v1782_v50  ;;  %v686_v0 = vadd.f32 %v995_v62, %v1782_v50 }
 0x1c3   : > { %746 = vst [vmem:[%s1786_s9 + $0x8] sm:$0xff] %v622_v63  ;;  %762 = vst [vmem:[%s1786_s9 + $0x88] sm:$0xff] %v686_v0  ;;  %v948_v1 = vpop.f32.mrb[4].mxu0  ;;  %v996_v2 = vpop.f32.mrb[4].mxu1 }
 0x1c4   : > { %v949_v3 = vpop.f32.mrb[5].mxu0  ;;  %v997_v4 = vpop.f32.mrb[5].mxu1 }
 0x1c5   : > { %v950_v5 = vadd.f32 %v949_v3, %v948_v1  ;;  %v998_v6 = vadd.f32 %v997_v4, %v996_v2  ;;  %v951_v7 = vpop.f32.mrb[6].mxu0  ;;  %v999_v8 = vpop.f32.mrb[6].mxu1 }
 0x1c6   : > { %v952_v9 = vpop.f32.mrb[7].mxu0  ;;  %v1000_v10 = vpop.f32.mrb[7].mxu1 }
 0x1c7   : > { %v627_v11 = vadd.f32 %v950_v5, %v1782_v50  ;;  %v691_v12 = vadd.f32 %v998_v6, %v1782_v50  ;;  %v953_v13 = vadd.f32 %v952_v9, %v951_v7  ;;  %v1001_v14 = vadd.f32 %v1000_v10, %v999_v8 }
 0x1c9   : > { %747 = vst [vmem:[%s1786_s9 + $0x10] sm:$0xff] %v627_v11  ;;  %763 = vst [vmem:[%s1786_s9 + $0x90] sm:$0xff] %v691_v12  ;;  %v630_v15 = vadd.f32 %v953_v13, %v1782_v50  ;;  %v694_v16 = vadd.f32 %v1001_v14, %v1782_v50 }
 0x1cb   : > { %748 = vst [vmem:[%s1786_s9 + $0x18] sm:$0xff] %v630_v15  ;;  %764 = vst [vmem:[%s1786_s9 + $0x98] sm:$0xff] %v694_v16  ;;  %v954_v17 = vpop.f32.mrb[8].mxu0  ;;  %v1002_v18 = vpop.f32.mrb[8].mxu1 }
 0x1cc   : > { %v955_v19 = vpop.f32.mrb[9].mxu0  ;;  %v1003_v20 = vpop.f32.mrb[9].mxu1 }
 0x1cd   : > { %v956_v21 = vadd.f32 %v955_v19, %v954_v17  ;;  %v1004_v22 = vadd.f32 %v1003_v20, %v1002_v18  ;;  %v957_v23 = vpop.f32.mrb[10].mxu0  ;;  %v1005_v24 = vpop.f32.mrb[10].mxu1 }
 0x1ce   : > { %v958_v25 = vpop.f32.mrb[11].mxu0  ;;  %v1006_v26 = vpop.f32.mrb[11].mxu1 }
 0x1cf   : > { %v635_v27 = vadd.f32 %v956_v21, %v1782_v50  ;;  %v699_v28 = vadd.f32 %v1004_v22, %v1782_v50  ;;  %v959_v29 = vadd.f32 %v958_v25, %v957_v23  ;;  %v1007_v30 = vadd.f32 %v1006_v26, %v1005_v24 }
 0x1d1   : > { %749 = vst [vmem:[%s1786_s9 + $0x20] sm:$0xff] %v635_v27  ;;  %765 = vst [vmem:[%s1786_s9 + $0xa0] sm:$0xff] %v699_v28  ;;  %v638_v31 = vadd.f32 %v959_v29, %v1782_v50  ;;  %v702_v32 = vadd.f32 %v1007_v30, %v1782_v50 }
 0x1d3   : > { %750 = vst [vmem:[%s1786_s9 + $0x28] sm:$0xff] %v638_v31  ;;  %766 = vst [vmem:[%s1786_s9 + $0xa8] sm:$0xff] %v702_v32  ;;  %v960_v33 = vpop.f32.mrb[12].mxu0  ;;  %v1008_v34 = vpop.f32.mrb[12].mxu1 }
 0x1d4   : > { %v961_v35 = vpop.f32.mrb[13].mxu0  ;;  %v1009_v36 = vpop.f32.mrb[13].mxu1 }
 0x1d5   : > { %v962_v37 = vadd.f32 %v961_v35, %v960_v33  ;;  %v1010_v38 = vadd.f32 %v1009_v36, %v1008_v34  ;;  %v963_v39 = vpop.f32.mrb[14].mxu0  ;;  %v1011_v40 = vpop.f32.mrb[14].mxu1 }
 0x1d6   : > { %v964_v41 = vpop.f32.mrb[15].mxu0  ;;  %v1012_v42 = vpop.f32.mrb[15].mxu1 }
 0x1d7   : > { %v643_v43 = vadd.f32 %v962_v37, %v1782_v50  ;;  %v707_v44 = vadd.f32 %v1010_v38, %v1782_v50  ;;  %v965_v45 = vadd.f32 %v964_v41, %v963_v39  ;;  %v1013_v46 = vadd.f32 %v1012_v42, %v1011_v40 }
 0x1d9   : > { %751 = vst [vmem:[%s1786_s9 + $0x30] sm:$0xff] %v643_v43  ;;  %767 = vst [vmem:[%s1786_s9 + $0xb0] sm:$0xff] %v707_v44  ;;  %v646_v47 = vadd.f32 %v965_v45, %v1782_v50  ;;  %v710_v48 = vadd.f32 %v1013_v46, %v1782_v50 }
 0x1db   : > { %752 = vst [vmem:[%s1786_s9 + $0x38] sm:$0xff] %v646_v47  ;;  %768 = vst [vmem:[%s1786_s9 + $0xb8] sm:$0xff] %v710_v48  ;;  %v966_v49 = vpop.f32.mrb[16].mxu0  ;;  %v1014_v51 = vpop.f32.mrb[16].mxu1 }
 0x1dc   : > { %v967_v52 = vpop.f32.mrb[17].mxu0  ;;  %v1015_v53 = vpop.f32.mrb[17].mxu1 }
 0x1dd   : > { %v968_v54 = vadd.f32 %v967_v52, %v966_v49  ;;  %v1016_v55 = vadd.f32 %v1015_v53, %v1014_v51  ;;  %v969_v56 = vpop.f32.mrb[18].mxu0  ;;  %v1017_v57 = vpop.f32.mrb[18].mxu1 }
 0x1de   : > { %v970_v58 = vpop.f32.mrb[19].mxu0  ;;  %v1018_v59 = vpop.f32.mrb[19].mxu1 }
 0x1df   : > { %v651_v60 = vadd.f32 %v968_v54, %v1782_v50  ;;  %v715_v61 = vadd.f32 %v1016_v55, %v1782_v50  ;;  %v971_v62 = vadd.f32 %v970_v58, %v969_v56  ;;  %v1019_v63 = vadd.f32 %v1018_v59, %v1017_v57 }
 0x1e1   : > { %753 = vst [vmem:[%s1786_s9 + $0x40] sm:$0xff] %v651_v60  ;;  %769 = vst [vmem:[%s1786_s9 + $0xc0] sm:$0xff] %v715_v61  ;;  %v654_v0 = vadd.f32 %v971_v62, %v1782_v50  ;;  %v718_v1 = vadd.f32 %v1019_v63, %v1782_v50 }
 0x1e3   : > { %754 = vst [vmem:[%s1786_s9 + $0x48] sm:$0xff] %v654_v0  ;;  %770 = vst [vmem:[%s1786_s9 + $0xc8] sm:$0xff] %v718_v1  ;;  %v972_v2 = vpop.f32.mrb[20].mxu0  ;;  %v1020_v3 = vpop.f32.mrb[20].mxu1 }
 0x1e4   : > { %v973_v4 = vpop.f32.mrb[21].mxu0  ;;  %v1021_v5 = vpop.f32.mrb[21].mxu1 }
 0x1e5   : > { %v974_v6 = vadd.f32 %v973_v4, %v972_v2  ;;  %v1022_v7 = vadd.f32 %v1021_v5, %v1020_v3  ;;  %v975_v8 = vpop.f32.mrb[22].mxu0  ;;  %v1023_v9 = vpop.f32.mrb[22].mxu1 }
 0x1e6   : > { %v976_v10 = vpop.f32.mrb[23].mxu0  ;;  %v1024_v11 = vpop.f32.mrb[23].mxu1 }
 0x1e7   : > { %v659_v12 = vadd.f32 %v974_v6, %v1782_v50  ;;  %v723_v13 = vadd.f32 %v1022_v7, %v1782_v50  ;;  %v977_v14 = vadd.f32 %v976_v10, %v975_v8  ;;  %v1025_v15 = vadd.f32 %v1024_v11, %v1023_v9 }
 0x1e9   : > { %755 = vst [vmem:[%s1786_s9 + $0x50] sm:$0xff] %v659_v12  ;;  %771 = vst [vmem:[%s1786_s9 + $0xd0] sm:$0xff] %v723_v13  ;;  %v662_v16 = vadd.f32 %v977_v14, %v1782_v50  ;;  %v726_v17 = vadd.f32 %v1025_v15, %v1782_v50 }
 0x1eb   : > { %756 = vst [vmem:[%s1786_s9 + $0x58] sm:$0xff] %v662_v16  ;;  %772 = vst [vmem:[%s1786_s9 + $0xd8] sm:$0xff] %v726_v17  ;;  %v978_v18 = vpop.f32.mrb[24].mxu0  ;;  %v1026_v19 = vpop.f32.mrb[24].mxu1 }
 0x1ec   : > { %v979_v20 = vpop.f32.mrb[25].mxu0  ;;  %v1027_v21 = vpop.f32.mrb[25].mxu1 }
 0x1ed   : > { %v980_v22 = vadd.f32 %v979_v20, %v978_v18  ;;  %v1028_v23 = vadd.f32 %v1027_v21, %v1026_v19  ;;  %v981_v24 = vpop.f32.mrb[26].mxu0  ;;  %v1029_v25 = vpop.f32.mrb[26].mxu1 }
 0x1ee   : > { %v982_v26 = vpop.f32.mrb[27].mxu0  ;;  %v1030_v27 = vpop.f32.mrb[27].mxu1 }
 0x1ef   : > { %v667_v28 = vadd.f32 %v980_v22, %v1782_v50  ;;  %v731_v29 = vadd.f32 %v1028_v23, %v1782_v50  ;;  %v983_v30 = vadd.f32 %v982_v26, %v981_v24  ;;  %v1031_v31 = vadd.f32 %v1030_v27, %v1029_v25 }
 0x1f1   : > { %757 = vst [vmem:[%s1786_s9 + $0x60] sm:$0xff] %v667_v28  ;;  %773 = vst [vmem:[%s1786_s9 + $0xe0] sm:$0xff] %v731_v29  ;;  %v670_v32 = vadd.f32 %v983_v30, %v1782_v50  ;;  %v734_v33 = vadd.f32 %v1031_v31, %v1782_v50 }
 0x1f3   : > { %758 = vst [vmem:[%s1786_s9 + $0x68] sm:$0xff] %v670_v32  ;;  %774 = vst [vmem:[%s1786_s9 + $0xe8] sm:$0xff] %v734_v33  ;;  %v984_v34 = vpop.f32.mrb[28].mxu0  ;;  %v1032_v35 = vpop.f32.mrb[28].mxu1 }
 0x1f4   : > { %v985_v36 = vpop.f32.mrb[29].mxu0  ;;  %v1033_v37 = vpop.f32.mrb[29].mxu1 }
 0x1f5   : > { %v986_v38 = vadd.f32 %v985_v36, %v984_v34  ;;  %v1034_v39 = vadd.f32 %v1033_v37, %v1032_v35  ;;  %v987_v40 = vpop.f32.mrb[30].mxu0  ;;  %v1035_v41 = vpop.f32.mrb[30].mxu1 }
 0x1f6   : > { %v988_v42 = vpop.f32.mrb[31].mxu0  ;;  %v1036_v43 = vpop.f32.mrb[31].mxu1 }
 0x1f7   : > { %v675_v44 = vadd.f32 %v986_v38, %v1782_v50  ;;  %v739_v45 = vadd.f32 %v1034_v39, %v1782_v50  ;;  %v989_v46 = vadd.f32 %v988_v42, %v987_v40  ;;  %v1037_v47 = vadd.f32 %v1036_v43, %v1035_v41 }
 0x1f9   : > { %759 = vst [vmem:[%s1786_s9 + $0x70] sm:$0xff] %v675_v44  ;;  %775 = vst [vmem:[%s1786_s9 + $0xf0] sm:$0xff] %v739_v45  ;;  %v678_v48 = vadd.f32 %v989_v46, %v1782_v50  ;;  %v742_v49 = vadd.f32 %v1037_v47, %v1782_v50 }
 0x1fb   : > { %760 = vst [vmem:[%s1786_s9 + $0x78] sm:$0xff] %v678_v48  ;;  %776 = vst [vmem:[%s1786_s9 + $0xf8] sm:$0xff] %v742_v49 }
 0x1fc   : > { %1444 = shalt.err (!%p1441_p5)
}
 0x1fd   : > { %s1445_s29 = scalar_lea.hbm %s1849_s7, 4096  ;;  %s1449_s20 = scalar_lea.hbm %s1909_s3, 8192 }
 0x1fe   : > { %p1446_p9 = scmp.ne.s32.totalorder %s1849_s7, %s1445_s29  ;;  %p1450_p3 = scmp.lt.u32.totalorder %s1849_s7, %s1909_s3 }
 0x1ff   : > { %p1451_p7 = scmp.lt.u32.totalorder %s1449_s20, %s1445_s29  ;;  %p1453_p4 = scmp.lt.u32.totalorder %s1445_s29, %s1849_s7 }
 0x200   : > { %p1447_p1 = pnand %p1446_p9, %p1644_p10 }
 0x201   : > { %p1452_p13 = por %p1451_p7, %p1450_p3 }
 0x202   : > { %p1448_p2 = pneg %p1447_p1 }
 0x203   : > { %p1454_p6 = por %p1453_p4, %p1452_p13 }
 0x205   : > { %p1455_p8 = pnand %p1454_p6, %p1448_p2 }
 0x207   : > { %1458 = shalt.err (!%p1455_p8)
}
 0x208   : > { %s1526_s9 = smov 128   ;;  %s1527_s10 = smov 8  }
 0x209   : > { %1060 = dma.vmem_to_hbm [thread:$0]  (%p1644_p10), %s1851_s11, 4096, %s1849_s7, %s778_s15, %s1526_s9, %s1526_s9, %s1527_s10  }
 0x20a PF: > { %s808_s18 = sand.u32 1, %s1497_s12   ;;  %p1927_p12 = scmp.ne.s32.totalorder %s1917_s23, 0 }
 0x20b   : > { %p1928_p11 = scmp.ge.s32.totalorder %s1517_s17, 2  ;;  %s809_s26 = scalar_lea.sflag [#allocation4], %s808_s18 }
 0x20d   : > { %p1071_p0 = pnand %p1928_p11, %p1927_p12 }
 0x20f   : > { %1492 = dma.done.wait (!%p1071_p0), %s809_s26, 4096  }
 0x210   : > { %1494 = vsyncadd (!%p1071_p0), %s809_s26, 4294963200  ;;  %s20_s17 = sadd.s32 1, %s1517_s17   ;;  %s1929_s12 = smov %s1501_s13 }
 0x211   : > { %p17_p5 = scmp.ge.s32.totalorder %s20_s17, 4   ;;  %s1930_s13 = smov %s1505_s14 }
 0x212   : > { %s1931_s14 = smov %s1653_s5  ;;  %s1932_s15 = smov %s1513_s16 }
 0x213   : > { %s1933_s16 = smov %s1935_s28  ;;  %19 = sbr.rel (!%p17_p5) target bundleno = 7 (0x7), region = 81 }
 0x21a   :  { %814 = vsyncpa [#allocation3], 1 }
 0x21b   :  { %816 = vsyncpa [#allocation3 + $0x1], 1 }
 0x21c   :  { %817 = vsyncpa [#allocation6], 1 }
 0x21d   :  { %818 = vsyncpa [#allocation4], 1 }
 0x21e   :  { %820 = vsyncpa [#allocation4 + $0x1], 1 }

</bundles_post_ra>
